<compile_context>
chip_gen: v6e
topology: v6e:2x2x1
jax: 0.10.0
libtpu: 0.0.40
codegen_flags: <defaults>
</compile_context>

<pallas_src>
import functools

import jax
import jax.numpy as jnp
import numpy as np
from jax.experimental import pallas as pl
from jax.experimental.pallas import tpu as pltpu


def _round_up(x: int, m: int) -> int:
    return ((x + m - 1) // m) * m


def _cdiv(a: int, b: int) -> int:
    return (a + b - 1) // b


# ----------------------------------------------------------------------------
# Pallas kernel (per grid step: one batch item, one lane-dense pixel tile):
#   x    : (F_l,  TP)  caller dtype   skip-connection pixels
#   gsc  : (F_int,TP)  gate_dtype     bn_scale * W_g(g), bilinearly upsampled
#   wxs  : (F_int,F_l)                bn_scale-folded W_x (bf16 on MXU path)
#   b    : (F_int,1)   f32            combined bias (bg+bx)*bn_scale + bn_shift
#   wp   : (F_int,1)   f32            psi weights (column)
#   bp   : (1,1)       f32            psi bias
#   out  : (F_l,  TP)  x.dtype        x * psi + x
# ----------------------------------------------------------------------------
def _attention_gate_kernel(x_ref, gsc_ref, wxs_ref, b_ref, wp_ref, bp_ref,
                           out_ref, *, use_mxu):
    x = x_ref[...]                                          # (F_l, TP)
    x_f32 = x.astype(jnp.float32)

    if use_mxu:
        # Realistic channel counts: MXU matmul in the (low-precision) weight
        # dtype, f32 accumulate.
        x1 = jnp.dot(wxs_ref[...], x.astype(wxs_ref.dtype),
                     preferred_element_type=jnp.float32)    # (F_int, TP)
    else:
        # Tiny channel counts: unrolled VPU broadcast-FMAs instead of a
        # K=F_l MXU call (avoids vmatmul push/pop latency).
        w = wxs_ref[...]                                    # (F_int, F_l) f32
        f_l = x_ref.shape[0]
        x1 = w[:, 0:1] * x_f32[0:1, :]
        for k in range(1, f_l):
            x1 = x1 + w[:, k:k + 1] * x_f32[k:k + 1, :]

    # + upsampled, pre-scaled W_g(g) + combined bias, ReLU (all f32 on VPU).
    z = jnp.maximum(x1 + gsc_ref[...].astype(jnp.float32) + b_ref[...], 0.0)

    # psi projection to one channel: VPU multiply + sublane reduce (XLU).
    logit = jnp.sum(z * wp_ref[...], axis=0, keepdims=True) + bp_ref[...]
    psi = jax.nn.sigmoid(logit)                             # (1, TP)

    out_ref[...] = (x_f32 * (psi + 1.0)).astype(out_ref.dtype)   # x*psi + x


# ----------------------------------------------------------------------------
# Glue helpers
# ----------------------------------------------------------------------------
def _bilinear_matrix(out_size: int, in_size: int) -> jnp.ndarray:
    """1-D bilinear resampling matrix, align_corners=True (PyTorch semantics)."""
    if out_size == 1 or in_size == 1:
        m = np.zeros((out_size, in_size), np.float32)
        m[:, 0] = 1.0
        return jnp.asarray(m)
    src = np.arange(out_size, dtype=np.float64) * (in_size - 1) / (out_size - 1)
    lo = np.minimum(np.floor(src).astype(np.int64), in_size - 1)
    hi = np.minimum(lo + 1, in_size - 1)
    frac = (src - lo).astype(np.float64)
    m = np.zeros((out_size, in_size), np.float64)
    m[np.arange(out_size), lo] += 1.0 - frac
    m[np.arange(out_size), hi] += frac
    return jnp.asarray(m, dtype=jnp.float32)


def init_params(key, F_g, F_l, F_int):
    """Deterministic synthetic parameters (same shapes as the nn.Module)."""
    ks = jax.random.split(key, 10)

    def conv_w(k, out_c, in_c):
        bound = 1.0 / np.sqrt(in_c)
        return jax.random.uniform(k, (out_c, in_c), jnp.float32, -bound, bound)

    def conv_b(k, out_c, in_c):
        bound = 1.0 / np.sqrt(in_c)
        return jax.random.uniform(k, (out_c,), jnp.float32, -bound, bound)

    return {
        "wg": conv_w(ks[0], F_int, F_g), "bg": conv_b(ks[1], F_int, F_g),
        "wx": conv_w(ks[2], F_int, F_l), "bx": conv_b(ks[3], F_int, F_l),
        "wp": conv_w(ks[4], 1, F_int),   "bp": conv_b(ks[5], 1, F_int),
        # BatchNorm2d (eval mode) parameters / running stats
        "gamma": jax.random.uniform(ks[6], (F_int,), jnp.float32, 0.5, 1.5),
        "beta":  0.1 * jax.random.normal(ks[7], (F_int,), jnp.float32),
        "mean":  0.1 * jax.random.normal(ks[8], (F_int,), jnp.float32),
        "var":   jax.random.uniform(ks[9], (F_int,), jnp.float32, 0.5, 1.5),
    }


def _vmem_caps():
    """(physical_vmem, vmem_limit_cap, tile_byte_budget), generation aware."""
    try:
        cap = int(pltpu.get_tpu_info().vmem_capacity_bytes)
    except Exception:
        cap = 64 << 20                     # conservative (v7x-sized) fallback
    if cap <= (64 << 20):                  # v7x-class: 64 MiB per TensorCore
        return cap, 48 << 20, 24 << 20
    return cap, 100 << 20, 48 << 20        # v5e / v6e: 128 MiB


# ----------------------------------------------------------------------------
# Wrapper: NCHW API matching the PyTorch module
# ----------------------------------------------------------------------------
@functools.partial(jax.jit, static_argnames=("gate_dtype",))
def attention_gate(x, g, params, *, gate_dtype=jnp.bfloat16):
    N, F_l, H, W = x.shape
    _, F_g, Hg, Wg = g.shape
    F_int = params["wg"].shape[0]
    eps = 1e-5
    f32 = jnp.float32

    # --- fold eval-mode BatchNorm into the conv weights / one combined bias --
    s = params["gamma"] / jnp.sqrt(params["var"] + eps)            # (F_int,)
    t = params["beta"] - params["mean"] * s                        # (F_int,)
    wgs = params["wg"].astype(f32) * s[:, None]                    # (F_int, F_g)
    wxs = params["wx"].astype(f32) * s[:, None]                    # (F_int, F_l)
    b_all = ((params["bg"] + params["bx"]) * s + t).reshape(F_int, 1).astype(f32)
    wp_col = params["wp"].astype(f32).T                            # (F_int, 1)
    bp = params["bp"].reshape(1, 1).astype(f32)

    # W_x path: MXU for realistic channel counts, VPU unroll for tiny ones.
    use_mxu = F_l > 16
    wxs = wxs.astype(gate_dtype) if use_mxu else wxs

    # --- W_g at coarse resolution, exact bilinear upsample, gate_dtype, and
    #     already in the (N, F_int, H*W) layout the kernel consumes -----------
    Ah = _bilinear_matrix(H, Hg)
    Aw = _bilinear_matrix(W, Wg)
    g1s = jnp.einsum("oc,nchw->nohw", wgs, g.astype(f32))          # (N,F_int,Hg,Wg)
    gsc = jnp.einsum("Hh,nohw,Ww->noHW", Ah, g1s, Aw).astype(gate_dtype)
    gsc = gsc.reshape(N, F_int, H * W)

    # --- x stays in caller layout & dtype: NCHW -> (N, F_l, H*W) is free -----
    x_v = x.reshape(N, F_l, H * W)
    x_isize = jnp.dtype(x.dtype).itemsize
    gsc_isize = jnp.dtype(gate_dtype).itemsize

    # --- generation-aware tile selection --------------------------------------
    HW = H * W
    HW128 = _round_up(HW, 128)
    max_steps = HW128 // 128
    # double-buffered bytes per lane column: x tile + out tile + gsc tile
    bytes_per_col = 2 * (2 * F_l * x_isize + F_int * gsc_isize)
    _, vmem_cap_limit, tile_budget = _vmem_caps()

    tile_from_budget = min(max((tile_budget // bytes_per_col) // 128 * 128, 1024),
                           32768)
    steps = _cdiv(HW128, min(tile_from_budget, HW128))
    # v7x megacore: want >= ~4 total grid points so both TensorCores get work
    # (neutral on v5e/v6e); never split below 128-lane tiles.
    if N * steps < 4:
        steps = min(max_steps, _cdiv(4, N))
    tile = _round_up(_cdiv(HW, steps), 128)    # tile * steps >= HW, tile % 128 == 0
    steps = _cdiv(HW128, tile)
    HW_pad = steps * tile

    if HW_pad != HW:
        # Zero columns are harmless (out == 0 there) and sliced off below.
        x_v = jnp.pad(x_v, ((0, 0), (0, 0), (0, HW_pad - HW)))
        gsc = jnp.pad(gsc, ((0, 0), (0, 0), (0, HW_pad - HW)))

    # --- VMEM budget: double-buffered tiles + weights + headroom -------------
    weight_bytes = 2 * (F_int * F_l * jnp.dtype(wxs.dtype).itemsize
                        + 3 * F_int * 4)
    vmem_limit = int(max(min(tile * bytes_per_col + weight_bytes + (4 << 20),
                             vmem_cap_limit),
                         16 << 20))

    kernel = functools.partial(_attention_gate_kernel, use_mxu=use_mxu)
    const = lambda n, i: (0, 0)
    tiled = lambda n, i: (n, 0, i)

    out_v = pl.pallas_call(
        kernel,
        out_shape=jax.ShapeDtypeStruct((N, F_l, HW_pad), x.dtype),
        grid_spec=pltpu.PrefetchScalarGridSpec(
            num_scalar_prefetch=0,
            grid=(N, HW_pad // tile),
            in_specs=[
                pl.BlockSpec((pl.Squeezed(), F_l, tile), tiled),    # x slab
                pl.BlockSpec((pl.Squeezed(), F_int, tile), tiled),  # scaled W_g(g)
                pl.BlockSpec((F_int, F_l), const),                  # W_x * bn_scale
                pl.BlockSpec((F_int, 1), const),                    # combined bias
                pl.BlockSpec((F_int, 1), const),                    # psi weights
                pl.BlockSpec((1, 1), const),                        # psi bias
            ],
            out_specs=pl.BlockSpec((pl.Squeezed(), F_l, tile), tiled),
        ),
        compiler_params=pltpu.CompilerParams(
            dimension_semantics=("parallel", "parallel"),
            vmem_limit_bytes=vmem_limit),
    )(x_v, gsc, wxs, b_all, wp_col, bp)

    if HW_pad != HW:
        out_v = out_v[:, :, :HW]
    return out_v.reshape(N, F_l, H, W)                     # free reshape to NCHW


# ----------------------------------------------------------------------------
# Pure-JAX reference (mirrors the PyTorch forward, eval-mode BN)
# ----------------------------------------------------------------------------
def attention_gate_ref(x, g, params):
    eps = 1e-5
    b = lambda v: v[None, :, None, None]
    g1 = jnp.einsum("oc,nchw->nohw", params["wg"], g) + b(params["bg"])
    x1 = jnp.einsum("oc,nchw->nohw", params["wx"], x) + b(params["bx"])
    Ah = _bilinear_matrix(x.shape[2], g.shape[2])
    Aw = _bilinear_matrix(x.shape[3], g.shape[3])
    g1 = jnp.einsum("Hh,nchw,Ww->ncHW", Ah, g1, Aw)
    z = (g1 + x1 - b(params["mean"])) / jnp.sqrt(b(params["var"]) + eps)
    z = jnp.maximum(z * b(params["gamma"]) + b(params["beta"]), 0.0)
    psi = jnp.einsum("oc,nchw->nohw", params["wp"], z) + b(params["bp"])
    psi = jax.nn.sigmoid(psi)
    return x * psi + x


if __name__ == "__main__":
    key = jax.random.PRNGKey(0)
    k_x, k_g, k_p = jax.random.split(key, 3)

    # Small shapes consistent with the module: x is the skip connection,
    # g is the (coarser) gating signal at half spatial resolution.
    N, F_l, F_g, F_int = 2, 4, 8, 8
    H = W = 16
    Hg = Wg = 8

    x = jax.random.normal(k_x, (N, F_l, H, W), jnp.float32)
    g = jax.random.normal(k_g, (N, F_g, Hg, Wg), jnp.float32)
    params = init_params(k_p, F_g, F_l, F_int)

    out = attention_gate(x, g, params)
    out = jax.block_until_ready(out)

    ref = attention_gate_ref(x, g, params)
    assert out.shape == x.shape and out.dtype == x.dtype
    # Tolerance loosened slightly: the upsampled gating slab travels as bf16
    # (pass gate_dtype=jnp.float32 for a full-precision escape hatch).
    assert np.allclose(np.asarray(out), np.asarray(ref), rtol=1e-2, atol=1e-2)

    print("KERNEL_OK")
</pallas_src>

<mosaic_0001>
module attributes {stable_mosaic.version = 11 : i64} {
  func.func @_attention_gate_kernel(%arg0: i32, %arg1: i32, %arg2: memref<1x4x128xf32, #tpu.memory_space<vmem>>, %arg3: memref<1x8x128xbf16, #tpu.memory_space<vmem>>, %arg4: memref<8x4xf32, #tpu.memory_space<vmem>>, %arg5: memref<8x1xf32, #tpu.memory_space<vmem>>, %arg6: memref<8x1xf32, #tpu.memory_space<vmem>>, %arg7: memref<1x1xf32, #tpu.memory_space<vmem>>, %arg8: memref<1x4x128xf32, #tpu.memory_space<vmem>>) attributes {dimension_semantics = [#tpu.dimension_semantics<parallel>, #tpu.dimension_semantics<parallel>], iteration_bounds = array<i64: 2, 2>, scalar_prefetch = 0 : i64, scratch_operands = 0 : i64, tpu.core_type = #tpu.core_type<tc>, window_params = [{transform_indices = @transform_0, window_bounds = array<i64: 1, 4, 128>}, {transform_indices = @transform_1, window_bounds = array<i64: 1, 8, 128>}, {pipeline_mode = #tpu.pipeline_mode<synchronous>, transform_indices = @transform_2, window_bounds = array<i64: 8, 4>}, {pipeline_mode = #tpu.pipeline_mode<synchronous>, transform_indices = @transform_3, window_bounds = array<i64: 8, 1>}, {pipeline_mode = #tpu.pipeline_mode<synchronous>, transform_indices = @transform_4, window_bounds = array<i64: 8, 1>}, {pipeline_mode = #tpu.pipeline_mode<synchronous>, transform_indices = @transform_5, window_bounds = array<i64: 1, 1>}, {transform_indices = @transform_6, window_bounds = array<i64: 1, 4, 128>}]} {
    %c0 = arith.constant 0 : index
    %c0_0 = arith.constant 0 : index
    %c0_1 = arith.constant 0 : index
    %0 = vector.load %arg2[%c0, %c0_0, %c0_1] : memref<1x4x128xf32, #tpu.memory_space<vmem>>, vector<1x4x128xf32>
    %1 = vector.shape_cast %0 : vector<1x4x128xf32> to vector<4x128xf32>
    %c0_2 = arith.constant 0 : index
    %c0_3 = arith.constant 0 : index
    %2 = vector.load %arg4[%c0_2, %c0_3] : memref<8x4xf32, #tpu.memory_space<vmem>>, vector<8x4xf32>
    %3 = vector.extract_strided_slice %2 {offsets = [0, 0], sizes = [8, 1], strides = [1, 1]} : vector<8x4xf32> to vector<8x1xf32>
    %4 = vector.extract_strided_slice %1 {offsets = [0, 0], sizes = [1, 128], strides = [1, 1]} : vector<4x128xf32> to vector<1x128xf32>
    %5 = vector.broadcast %3 : vector<8x1xf32> to vector<8x128xf32>
    %6 = vector.broadcast %4 : vector<1x128xf32> to vector<8x128xf32>
    %7 = arith.mulf %5, %6 : vector<8x128xf32>
    %8 = vector.extract_strided_slice %2 {offsets = [0, 1], sizes = [8, 1], strides = [1, 1]} : vector<8x4xf32> to vector<8x1xf32>
    %9 = vector.extract_strided_slice %1 {offsets = [1, 0], sizes = [1, 128], strides = [1, 1]} : vector<4x128xf32> to vector<1x128xf32>
    %10 = vector.broadcast %8 : vector<8x1xf32> to vector<8x128xf32>
    %11 = vector.broadcast %9 : vector<1x128xf32> to vector<8x128xf32>
    %12 = arith.mulf %10, %11 : vector<8x128xf32>
    %13 = arith.addf %7, %12 : vector<8x128xf32>
    %14 = vector.extract_strided_slice %2 {offsets = [0, 2], sizes = [8, 1], strides = [1, 1]} : vector<8x4xf32> to vector<8x1xf32>
    %15 = vector.extract_strided_slice %1 {offsets = [2, 0], sizes = [1, 128], strides = [1, 1]} : vector<4x128xf32> to vector<1x128xf32>
    %16 = vector.broadcast %14 : vector<8x1xf32> to vector<8x128xf32>
    %17 = vector.broadcast %15 : vector<1x128xf32> to vector<8x128xf32>
    %18 = arith.mulf %16, %17 : vector<8x128xf32>
    %19 = arith.addf %13, %18 : vector<8x128xf32>
    %20 = vector.extract_strided_slice %2 {offsets = [0, 3], sizes = [8, 1], strides = [1, 1]} : vector<8x4xf32> to vector<8x1xf32>
    %21 = vector.extract_strided_slice %1 {offsets = [3, 0], sizes = [1, 128], strides = [1, 1]} : vector<4x128xf32> to vector<1x128xf32>
    %22 = vector.broadcast %20 : vector<8x1xf32> to vector<8x128xf32>
    %23 = vector.broadcast %21 : vector<1x128xf32> to vector<8x128xf32>
    %24 = arith.mulf %22, %23 : vector<8x128xf32>
    %25 = arith.addf %19, %24 : vector<8x128xf32>
    %c0_4 = arith.constant 0 : index
    %c0_5 = arith.constant 0 : index
    %c0_6 = arith.constant 0 : index
    %26 = vector.load %arg3[%c0_4, %c0_5, %c0_6] : memref<1x8x128xbf16, #tpu.memory_space<vmem>>, vector<1x8x128xbf16>
    %27 = vector.shape_cast %26 : vector<1x8x128xbf16> to vector<8x128xbf16>
    %28 = arith.extf %27 : vector<8x128xbf16> to vector<8x128xf32>
    %29 = arith.addf %25, %28 : vector<8x128xf32>
    %c0_7 = arith.constant 0 : index
    %c0_8 = arith.constant 0 : index
    %30 = vector.load %arg5[%c0_7, %c0_8] : memref<8x1xf32, #tpu.memory_space<vmem>>, vector<8x1xf32>
    %31 = vector.broadcast %30 : vector<8x1xf32> to vector<8x128xf32>
    %32 = arith.addf %29, %31 : vector<8x128xf32>
    %cst = arith.constant 0.000000e+00 : f32
    %33 = vector.broadcast %cst : f32 to vector<8x128xf32>
    %34 = arith.maximumf %32, %33 : vector<8x128xf32>
    %c0_9 = arith.constant 0 : index
    %c0_10 = arith.constant 0 : index
    %35 = vector.load %arg6[%c0_9, %c0_10] : memref<8x1xf32, #tpu.memory_space<vmem>>, vector<8x1xf32>
    %36 = vector.broadcast %35 : vector<8x1xf32> to vector<8x128xf32>
    %37 = arith.mulf %34, %36 : vector<8x128xf32>
    %cst_11 = arith.constant dense<0.000000e+00> : vector<128xf32>
    %38 = vector.multi_reduction <add>, %37, %cst_11 [0] : vector<8x128xf32> to vector<128xf32>
    %39 = vector.shape_cast %38 : vector<128xf32> to vector<1x128xf32>
    %c0_12 = arith.constant 0 : index
    %c0_13 = arith.constant 0 : index
    %40 = vector.load %arg7[%c0_12, %c0_13] : memref<1x1xf32, #tpu.memory_space<vmem>>, vector<1x1xf32>
    %41 = vector.broadcast %40 : vector<1x1xf32> to vector<1x128xf32>
    %42 = arith.addf %39, %41 : vector<1x128xf32>
    %43 = arith.negf %42 : vector<1x128xf32>
    %44 = math.exp %43 : vector<1x128xf32>
    %cst_14 = arith.constant 1.000000e+00 : f32
    %45 = vector.broadcast %cst_14 : f32 to vector<1x128xf32>
    %46 = arith.addf %45, %44 : vector<1x128xf32>
    %47 = arith.divf %45, %46 : vector<1x128xf32>
    %cst_15 = arith.constant 1.000000e+00 : f32
    %48 = vector.broadcast %cst_15 : f32 to vector<1x128xf32>
    %49 = arith.addf %47, %48 : vector<1x128xf32>
    %50 = vector.broadcast %49 : vector<1x128xf32> to vector<4x128xf32>
    %51 = arith.mulf %1, %50 : vector<4x128xf32>
    %c0_16 = arith.constant 0 : index
    %c0_17 = arith.constant 0 : index
    %c0_18 = arith.constant 0 : index
    %52 = vector.load %arg8[%c0_16, %c0_17, %c0_18] : memref<1x4x128xf32, #tpu.memory_space<vmem>>, vector<1x4x128xf32>
    %53 = vector.shape_cast %52 : vector<1x4x128xf32> to vector<4x128xf32>
    %54 = vector.shape_cast %51 : vector<4x128xf32> to vector<1x4x128xf32>
    tpu.vector_store %arg8[%c0_16, %c0_17, %c0_18], %54 {strides = array<i32>} : memref<1x4x128xf32, #tpu.memory_space<vmem>>, vector<1x4x128xf32>,
    return
  }
  func.func @transform_0(%arg0: i32, %arg1: i32) -> (i32, i32, i32) {
    %c0_i32 = arith.constant 0 : i32
    %c0_i32_0 = arith.constant 0 : i32
    return %arg0, %c0_i32, %arg1 : i32, i32, i32
  }
  func.func @transform_1(%arg0: i32, %arg1: i32) -> (i32, i32, i32) {
    %c0_i32 = arith.constant 0 : i32
    %c0_i32_0 = arith.constant 0 : i32
    return %arg0, %c0_i32, %arg1 : i32, i32, i32
  }
  func.func @transform_2(%arg0: i32, %arg1: i32) -> (i32, i32) {
    %c0_i32 = arith.constant 0 : i32
    %c0_i32_0 = arith.constant 0 : i32
    %c0_i32_1 = arith.constant 0 : i32
    return %c0_i32, %c0_i32_0 : i32, i32
  }
  func.func @transform_3(%arg0: i32, %arg1: i32) -> (i32, i32) {
    %c0_i32 = arith.constant 0 : i32
    %c0_i32_0 = arith.constant 0 : i32
    %c0_i32_1 = arith.constant 0 : i32
    return %c0_i32, %c0_i32_0 : i32, i32
  }
  func.func @transform_4(%arg0: i32, %arg1: i32) -> (i32, i32) {
    %c0_i32 = arith.constant 0 : i32
    %c0_i32_0 = arith.constant 0 : i32
    %c0_i32_1 = arith.constant 0 : i32
    return %c0_i32, %c0_i32_0 : i32, i32
  }
  func.func @transform_5(%arg0: i32, %arg1: i32) -> (i32, i32) {
    %c0_i32 = arith.constant 0 : i32
    %c0_i32_0 = arith.constant 0 : i32
    %c0_i32_1 = arith.constant 0 : i32
    return %c0_i32, %c0_i32_0 : i32, i32
  }
  func.func @transform_6(%arg0: i32, %arg1: i32) -> (i32, i32, i32) {
    %c0_i32 = arith.constant 0 : i32
    %c0_i32_0 = arith.constant 0 : i32
    return %arg0, %c0_i32, %arg1 : i32, i32, i32
  }
}

</mosaic_0001>

<bundles_post_ra>
// kernel: attention_gate.1
= control target key start
LH: loop header
LB: loop body
LE: loop exit
PB: predicated region body
PF: predicated region fallthrough
CT: control target
= control target key end

     0   :  { %s656_s23 = smov 0   ;;  %s658_s24 = smov 0   ;;  %s732_s0 = inlined_call_operand.vmem [shape: f32[2,4,256], index: 0, kind: input, shape index: {}]   ;;  %s733_s1 = inlined_call_operand.vmem [shape: bf16[2,8,256], index: 1, kind: input, shape index: {}]   ;;  %s734_s2 = inlined_call_operand.vmem [shape: f32[8,4], index: 2, kind: input, shape index: {}]   ;;  %s735_s3 = inlined_call_operand.vmem [shape: f32[8,1], index: 3, kind: input, shape index: {}]   ;;  %s736_s4 = inlined_call_operand.vmem [shape: f32[8,1], index: 4, kind: input, shape index: {}]   ;;  %s737_s5 = inlined_call_operand.<no memory space> [shape: f32[1,1], index: 5, kind: input, shape index: {}]   ;;  %s738_s6 = inlined_call_operand.vmem [shape: f32[2,4,256], index: 6, kind: output, shape index: {}]  }
   0x1   :  { %v11_v0 = vstv %s737_s5  ;;  %s660_s25 = smov 0   ;;  %s662_s26 = smov 0  }
   0x2   :  { %12 = vst [vmem:[#allocation2] sm:$0x1] %v11_v0  ;;  %s664_s27 = smov 0  }
   0x3 LB: > { %s27_s5 = sadd.s32 1, %s604_s25  ;;  %s30_s28 = sadd.s32 1, %s608_s26  ;;  %s612_s27 = sphi %s664_s27, %s18_s27   ;;  %s608_s26 = sphi %s662_s26, %s742_s26   ;;  %s604_s25 = sphi %s660_s25, %s741_s25   ;;  %s600_s24 = sphi %s658_s24, %s740_s24   ;;  %s596_s23 = sphi %s656_s23, %s739_s23  }
   0x4   : > { %p28_p0 = scmp.ge.s32.totalorder %s27_s5, 2  ;;  %p510_p1 = scmp.ge.s32.totalorder %s612_s27, 1 }
   0x5   : > { %p248_p2 = scmp.lt.s32.totalorder %s612_s27, 5 }
   0x6   : > { %s744_s5 = smov (%p28_p0, %s27_s5), 0  ;;  %s746_s28 = smov (!%p28_p0, %s30_s28), %s608_s26 }
   0x7   : > { %p249_p3 = pnand %p510_p1, %p248_p2  ;;  %p32_p4 = scmp.ge.s32.totalorder %s746_s28, 2 }
   0x8   : > { %p292_p5 = scmp.lt.s32.totalorder (!%p249_p3), %s600_s24, 1  ;;  %p294_p6 = scmp.lt.s32.totalorder (!%p249_p3), %s596_s23, 1 }
   0x9   : > { %s748_s28 = smov (%p32_p4, %s746_s28), 0  ;;  %252 = sbr.rel (%p249_p3) target bundleno = 212 (0xd4), region = 44 }
   0xe   : > { %v317_v1 = vld [vmem:[%s734_s2] sm:$0xff]  ;;  %v614_v2 = vmov 0   ;;  %v615_v3 = vmov 2   ;;  %v616_v4 = vmov 1   ;;  %v617_v5 = vmov 3   ;;  %s750_s24 = smov (!%p292_p5, %s600_s24), 1 }
   0xf   : > { %564 = vset.pattern.permute.xlu0 %v614_v2  ;;  %566 = vset.pattern.permute.xlu1 %v615_v3  ;;  %v361_v6 = vld [vmem:[%s735_s3] sm:$0xff]  ;;  %s752_s23 = smov (!%p294_p6, %s596_s23), 1  ;;  %s511_s11 = sshll.u32 %s750_s24, 1  ;;  %v323_v9 = vlaneseq }
  0x10   : > { %320 = vperm.xlu0 %564, %v317_v1   ;;  %339 = vperm.xlu1 %566, %v317_v1   ;;  %v369_v7 = vld [vmem:[%s736_s4] sm:$0xff]  ;;  %s297_s12 = sadd.s32 %s511_s11, %s752_s23 }
  0x11   : > { %v382_v8 = vld [vmem:[#allocation2] sm:$0x1]  ;;  %s703_s13 = sshll.u32 %s297_s12, 2  ;;  %v324_v10 = vshrl.u32 %v323_v9, 7 }
  0x12   : > { %s299_s16 = scalar_lea.vmem %s732_s0, %s703_s13  ;;  %s307_s19 = scalar_lea.vmem %s733_s1, %s703_s13 }
  0x13   : > { %v325_v11 = vsub.s32 0, %v324_v10  ;;  %v334_v12 = vsub.s32 1, %v324_v10  ;;  %v316_v13 = vld [vmem:[%s299_s16] sm:$0xf]  ;;  %v344_v15 = vsub.s32 2, %v324_v10  ;;  %v354_v16 = vsub.s32 3, %v324_v10  ;;  %s315_s22 = scalar_lea.vmem %s738_s6, %s703_s13 }
  0x14   : > { %565 = vset.pattern.permute.xlu0 %v616_v4  ;;  %567 = vset.pattern.permute.xlu1 %v617_v5  ;;  %v358_v26 = vld [vmem:[%s307_s19] sm:$0xf] }
  0x15   : > { %329 = vperm.xlu0 %565, %v317_v1   ;;  %349 = vperm.xlu1 %567, %v317_v1   ;;  %v326_v18 = vrot.slane %v316_v13, %v325_v11  ;;  %v335_v19 = vrot.slane %v316_v13, %v334_v12  ;;  %v345_v20 = vrot.slane %v316_v13, %v344_v15  ;;  %v359_v31 = vunpack.c.l.bf16 %v358_v26 }
  0x16   : > { %v355_v21 = vrot.slane %v316_v13, %v354_v16 }
  0x19   : > { %568 = vset.pattern.permute.xlu1 %v614_v2  ;;  %569 = vset.pattern.permute.xlu0 %v614_v2 }
  0x1a   : > { %364 = vperm.xlu1 %568, %v361_v6   ;;  %372 = vperm.xlu0 %569, %v369_v7  }
  0x1e   : > { %385 = vperm.xlu1 %568, %v382_v8  }
  0x8b   : > { %v321_v14 = vpop.permute.xlu0 %320  ;;  %v340_v17 = vpop.permute.xlu1 %339 }
  0x8c   : > { %v327_v23 = vmul.f32 %v326_v18, %v321_v14  ;;  %v346_v27 = vmul.f32 %v345_v20, %v340_v17 }
  0x90   : > { %v330_v22 = vpop.permute.xlu0 %329  ;;  %v350_v25 = vpop.permute.xlu1 %349 }
  0x91   : > { %v336_v24 = vmul.f32 %v335_v19, %v330_v22  ;;  %v356_v29 = vmul.f32 %v355_v21, %v350_v25 }
  0x93   : > { %v337_v28 = vadd.f32 %v336_v24, %v327_v23 }
  0x95   : > { %v347_v30 = vadd.f32 %v346_v27, %v337_v28  ;;  %v365_v34 = vpop.permute.xlu1 %364  ;;  %v373_v36 = vpop.permute.xlu0 %372 }
  0x97   : > { %v357_v32 = vadd.f32 %v356_v29, %v347_v30 }
  0x99   : > { %v360_v33 = vadd.f32 %v359_v31, %v357_v32  ;;  %v386_v43 = vpop.permute.xlu1 %385 }
  0x9a   : > { %v391_v45 = vrot.slane %v386_v43, %v325_v11 }
  0x9b   : > { %v367_v35 = vadd.f32 %v365_v34, %v360_v33 }
  0x9d   : > { %v368_v37 = vmax.f32 %v367_v35, 0.0 }
  0x9f   : > { %v375_v38 = vmul.f32 %v373_v36, %v368_v37 }
  0xa1   : > { %v376_v39 = vrot.slane %v375_v38, 4 }
  0xa3   : > { %v377_v40 = vadd.f32 %v376_v39, %v375_v38 }
  0xa5   : > { %v378_v41 = vrot.slane %v377_v40, 2 }
  0xa7   : > { %v379_v42 = vadd.f32 %v378_v41, %v377_v40 }
  0xa9   : > { %v380_v44 = vrot.slane %v379_v42, 1 }
  0xab   : > { %v381_v46 = vadd.f32 %v380_v44, %v379_v42 }
  0xad   : > { %v392_v47 = vadd.f32 %v391_v45, %v381_v46 }
  0xaf   : > { %v517_v48 = vmul.f32 -1.442695, %v392_v47 }
  0xb1   : > { %570 = vpow2.f32 %v517_v48 }
  0xbe   : > { %v571_v49 = vpop.eup %570 }
  0xbf   : > { %v396_v50 = vadd.f32 1.0, %v571_v49 }
  0xc1   : > { %572 = vrcp.f32 %v396_v50 }
  0xce   : > { %v573_v51 = vpop.eup %572 }
  0xcf   : > { %v399_v52 = vadd.f32 1.0, %v573_v51 }
  0xd1   : > { %v400_v53 = vmul.f32 %v399_v52, %v316_v13 }
  0xd3   : > { %401 = vst [vmem:[%s315_s22] sm:$0xf] %v400_v53 }
  0xd4 PF: > { %s18_s27 = sadd.s32 1, %s612_s27   ;;  %s739_s23 = smov %s604_s25 }
  0xd5   : > { %p15_p7 = scmp.ge.s32.totalorder %s18_s27, 6   ;;  %s740_s24 = smov %s608_s26 }
  0xd6   : > { %s741_s25 = smov %s744_s5  ;;  %s742_s26 = smov %s748_s28 }
  0xd7   :  { %17 = sbr.rel (!%p15_p7) target bundleno = 3 (0x3), region = 77 }

</bundles_post_ra>
